<compile_context>
chip_gen: v7x
topology: tpu7x:2x2x1
jax: 0.10.0
libtpu: 0.0.40
codegen_flags: <defaults>
</compile_context>

<pallas_src>
import jax
import jax.numpy as jnp
from jax.experimental import pallas as pl
from jax.experimental.pallas import tpu as pltpu


def _copy_kernel(sel_ref, x_ref, o_ref):
    """Pure passthrough: gather is done by the input BlockSpec's index_map."""
    del sel_ref  # only consumed by the index_maps
    o_ref[...] = x_ref[...]


def _pick_frame_tile(bf, itemsize, cap=512):
    """Largest divisor of `bf` that is sublane-aligned and <= cap."""
    sub = max(8, 32 // max(itemsize, 1))  # 8 for f32, 16 for bf16, 32 for int8
    for t in range(min(cap, bf), 0, -1):
        if bf % t == 0 and t % sub == 0:
            return t
    return bf  # no aligned divisor: full axis is always a legal block shape


def visual_token_random_selection(x, *, max_frames, topk, key, training=True):
    """JAX/Pallas equivalent of VisualTokenRandomSelection.forward.

    x: (B, L, D) with L = max_frames * N  (N tokens per frame, token 0 = cls).
    Returns: (output of shape (B, max_frames * (1 + topk), D), selected_indices).
    """
    B, L, D = x.shape
    assert L % max_frames == 0, "L must be divisible by max_frames"
    N = L // max_frames
    patch_len = N - 1
    assert 0 < topk <= patch_len, "topk must be in (0, N-1]"
    # TODO(synk): the selective-DMA fast path needs a lane-aligned hidden dim;
    # a full-frame in-kernel gather fallback would be required for D % 128 != 0.
    assert D % 128 == 0, "hidden dim must be a multiple of 128"

    BF = B * max_frames
    K1 = 1 + topk

    # torch.randperm(patch_len)[:topk].sort()[0] -- one permutation shared by
    # all frames / batch elements, exactly like the reference forward.
    perm = jax.random.permutation(key, patch_len)[:topk]
    sel = jnp.sort(perm).astype(jnp.int32)
    # Prepend the cls token (index 0); spatial indices shift by +1.
    sel_full = jnp.concatenate([jnp.zeros((1,), jnp.int32), sel + 1])

    # Frame-flattened 2-D view: rows = frames, token t = columns [t*D,(t+1)*D).
    # This reshape is free (contiguous).
    x2d = x.reshape(BF, N * D)

    f_tile = _pick_frame_tile(BF, x.dtype.itemsize)
    grid = (BF // f_tile, K1)

    out2d = pl.pallas_call(
        _copy_kernel,
        out_shape=jax.ShapeDtypeStruct((BF, K1 * D), x.dtype),
        grid_spec=pltpu.PrefetchScalarGridSpec(
            num_scalar_prefetch=1,
            grid=grid,
            in_specs=[
                # Only the selected token slab of each frame tile is DMA'd.
                pl.BlockSpec((f_tile, D), lambda f, t, sel_ref: (f, sel_ref[t])),
            ],
            out_specs=pl.BlockSpec((f_tile, D), lambda f, t, sel_ref: (f, t)),
        ),
        compiler_params=pltpu.CompilerParams(
            dimension_semantics=("parallel", "arbitrary"),
            vmem_limit_bytes=32 * 1024 * 1024,
        ),
    )(sel_full, x2d)

    # (BF, K1*D) is contiguously identical to (B, max_frames*K1, D).
    return out2d.reshape(B, max_frames * K1, D), sel


def _reference(x, sel, max_frames):
    """Pure-JAX reference using the same selected indices."""
    B, L, D = x.shape
    N = L // max_frames
    xf = x.reshape(B * max_frames, N, D)
    cls_tok = xf[:, :1, :]
    picked = jnp.take(xf, sel + 1, axis=1)
    out = jnp.concatenate([cls_tok, picked], axis=1)
    return out.reshape(B, -1, D)


if __name__ == "__main__":
    # Small, forward-consistent shapes (B*max_frames = 8 -> one full f32 tile).
    B = 2
    max_frames = 4
    n_patches = 16            # spatial tokens per frame
    N = 1 + n_patches         # +1 cls token
    D = 128                   # hidden dim
    topk = 8
    L = max_frames * N        # x: (2, 68, 128)

    key = jax.random.PRNGKey(0)
    kx, kperm = jax.random.split(key)
    x = jax.random.normal(kx, (B, L, D), dtype=jnp.float32)

    out, sel = visual_token_random_selection(
        x, max_frames=max_frames, topk=topk, key=kperm, training=True)
    out = jax.block_until_ready(out)

    ref = _reference(x, sel, max_frames)
    assert out.shape == (B, max_frames * (1 + topk), D), out.shape
    assert jnp.array_equal(out, ref), "mismatch vs pure-JAX reference"

    print("KERNEL_OK")
</pallas_src>

<mosaic_0001>
module attributes {stable_mosaic.version = 11 : i64} {
  func.func @_copy_kernel(%arg0: i32, %arg1: i32, %arg2: memref<9xi32, #tpu.memory_space<smem>>, %arg3: memref<8x128xf32, #tpu.memory_space<vmem>>, %arg4: memref<8x128xf32, #tpu.memory_space<vmem>>) attributes {dimension_semantics = [#tpu.dimension_semantics<parallel>, #tpu.dimension_semantics<arbitrary>], iteration_bounds = array<i64: 1, 9>, scalar_prefetch = 1 : i64, scratch_operands = 0 : i64, tpu.core_type = #tpu.core_type<tc>, window_params = [{transform_indices = @transform_0, window_bounds = array<i64: 8, 128>}, {transform_indices = @transform_1, window_bounds = array<i64: 8, 128>}]} {
    %c0 = arith.constant 0 : index
    %c0_0 = arith.constant 0 : index
    %0 = vector.load %arg3[%c0, %c0_0] : memref<8x128xf32, #tpu.memory_space<vmem>>, vector<8x128xf32>
    %c0_1 = arith.constant 0 : index
    %c0_2 = arith.constant 0 : index
    %1 = vector.load %arg4[%c0_1, %c0_2] : memref<8x128xf32, #tpu.memory_space<vmem>>, vector<8x128xf32>
    tpu.vector_store %arg4[%c0_1, %c0_2], %0 {strides = array<i32>} : memref<8x128xf32, #tpu.memory_space<vmem>>, vector<8x128xf32>,
    return
  }
  func.func @transform_0(%arg0: i32, %arg1: i32, %arg2: memref<9xi32, #tpu.memory_space<smem>>) -> (i32, i32) {
    %0 = arith.index_cast %arg1 : i32 to index
    %1 = memref.load %arg2[%0] : memref<9xi32, #tpu.memory_space<smem>>
    %c0_i32 = arith.constant 0 : i32
    return %arg0, %1 : i32, i32
  }
  func.func @transform_1(%arg0: i32, %arg1: i32, %arg2: memref<9xi32, #tpu.memory_space<smem>>) -> (i32, i32) {
    %c0_i32 = arith.constant 0 : i32
    return %arg0, %arg1 : i32, i32
  }
}

</mosaic_0001>

<bundles_post_ra>
// kernel: tpu_custom_call.1
= control target key start
LH: loop header
LB: loop body
LE: loop exit
PB: predicated region body
PF: predicated region fallthrough
CT: control target
= control target key end

     0   :  { %s746_s0 = inlined_call_operand.hbm [shape: s32[9], index: 0, kind: input, shape index: {}]   ;;  %s747_s1 = inlined_call_operand.hbm [shape: f32[8,2176], index: 1, kind: input, shape index: {}]   ;;  %s748_s2 = inlined_call_operand.hbm [shape: f32[8,1152], index: 2, kind: output, shape index: {}]  }
   0x1   :  { %s363_s11 = scalar_lea.hbm %s746_s0, 16 }
   0x2   :  { %p364_p0 = scmp.ne.s32.totalorder %s746_s0, %s363_s11  ;;  %p367_p1 = scmp.lt.u32.totalorder %s363_s11, %s746_s0 }
   0x4   :  { %p369_p2 = pnand %p367_p1, %p364_p0 }
   0x6   :  { %372 = shalt.err (!%p369_p2)  }
   0x7   :  { %s513_s16 = smov [#allocation3]  }
   0x8   :  { %8 = dma.hbm_to_smem %s746_s0, 16, %s513_s16, [#allocation2] }
   0x9   :  { %467 = dma.done.wait [#allocation2], 16 }
   0xa   :  { %468 = vsyncadd [#allocation2], 4294967280 }
   0xb   :  { %10 = sfence }
   0xc   :  { %11 = vsyncpa [#allocation5], 0 }
   0xd   :  { %13 = vsyncpa [#allocation5 + $0x1], 0 }
   0xe   :  { %14 = vsyncpa [#allocation6], 0 }
   0xf   :  { %16 = vsyncpa [#allocation6 + $0x1], 0  ;;  %s543_s19 = smov 0   ;;  %s545_s20 = smov 0  }
  0x10   :  { %s547_s21 = smov 0   ;;  %s549_s22 = smov 0  }
  0x11   :  { %s551_s23 = smov 0   ;;  %s553_s24 = smov 0  }
  0x12   :  { %s555_s0 = smov 0   ;;  %s557_s25 = smov 0  }
  0x13   :  { %s559_s26 = smov 0  }
  0x14 LB: > { %s259_s27 = sadd.s32 4294967295, %s511_s26   ;;  %s260_s28 = sadd.s32 4294967294, %s511_s26   ;;  %s511_s26 = sphi %s559_s26, %s22_s26   ;;  %s507_s25 = sphi %s557_s25, %s767_s25   ;;  %s503_s0 = sphi %s555_s0, %s766_s0   ;;  %s499_s24 = sphi %s553_s24, %s765_s24   ;;  %s495_s23 = sphi %s551_s23, %s764_s23   ;;  %s491_s22 = sphi %s549_s22, %s763_s22   ;;  %s487_s21 = sphi %s547_s21, %s762_s21   ;;  %s483_s20 = sphi %s545_s20, %s761_s20   ;;  %s479_s19 = sphi %s543_s19, %s760_s19  }
  0x15   : > { %s31_s29 = sadd.s32 1, %s507_s25  ;;  %s38_s30 = sld [smem:[#allocation3 + %s507_s25]] }
  0x16   : > { %p32_p3 = scmp.ge.s32.totalorder %s31_s29, 9  ;;  %s45_s3 = sadd.s32 1, %s499_s24 }
  0x17   : > { %p52_p4 = scmp.ne.s32.totalorder %s499_s24, %s495_s23  ;;  %p53_p5 = scmp.eq.s32.totalorder %s511_s26, 0 }
  0x18   : > { %s769_s29 = smov (%p32_p3, %s31_s29), 0  ;;  %p58_p7 = scmp.ne.s32.totalorder %s495_s23, %s491_s22 }
  0x19   : > { %p596_p6 = por %p53_p5, %p52_p4  ;;  %s39_s5 = sld [smem:[#allocation3 + %s769_s29]] }
  0x1a   : > { %p59_p8 = scmp.eq.s32.totalorder %s259_s27, 0  ;;  %s69_s6 = ssub.s32 %s507_s25, %s769_s29 }
  0x1b   : > { %s73_s7 = sadd.s32 1, %s487_s21  ;;  %p71_p10 = scmp.eq.s32.totalorder %s69_s6, 0 }
  0x1c   : > { %p605_p9 = por %p59_p8, %p58_p7  ;;  %p83_p11 = scmp.ne.s32.totalorder %s487_s21, %s483_s20 }
  0x1d   : > { %p84_p12 = scmp.eq.s32.totalorder %s259_s27, 8  ;;  %p89_p0 = scmp.ne.s32.totalorder %s483_s20, %s479_s19 }
  0x1e   : > { %s752_s8 = scalar_select %p605_p9, 1, 0 }
  0x1f   : > { %s612_s9 = scalar_select %p71_p10, %s487_s21, %s73_s7  }
  0x20   : > { %p614_p13 = por %p84_p12, %p83_p11  ;;  %s41_s11 = ssub.s32 %s38_s30, %s39_s5 }
  0x21   : > { %p90_p1 = scmp.eq.s32.totalorder %s260_s28, 8  ;;  %p43_p2 = scmp.eq.s32.totalorder %s41_s11, 0 }
  0x22   : > { %s753_s10 = scalar_select %p614_p13, 1, 0 }
  0x23   : > { %p620_p3 = por %p90_p1, %p89_p0  ;;  %p288_p4 = scmp.lt.s32.totalorder %s511_s26, 9 }
  0x24   : > { %s626_s13 = scalar_select %p43_p2, %s499_s24, %s45_s3  }
  0x25   : > { %s754_s12 = scalar_select %p620_p3, 1, 0 }
  0x26   : > { %s110_s14 = sand.u32 1, %s499_s24   ;;  %p631_p5 = pnand %p288_p4, %p596_p6 }
  0x27   : > { %s263_s16 = sshll.u32 %s110_s14, 3  ;;  %p265_p7 = scmp.ge.s32.totalorder %s511_s26, 1 }
  0x28   : > { %s272_s17 = scalar_select %p596_p6, [#allocation3], [#allocation8] }
  0x29   : > { %s273_s18 = scalar_select %p596_p6, %s507_s25, 0 }
  0x2a   : > { %s771_s17 = smov (!%p288_p4, %s272_s17), [#allocation9]  ;;  %p129_p8 = scmp.lt.s32.totalorder %s511_s26, 10 }
  0x2b   : > { %s773_s18 = smov (!%p288_p4, %s273_s18), 0  ;;  %s114_s27 = scalar_lea.vmem [#allocation4], %s263_s16 }
  0x2c   : > { %s115_s22 = sld [smem:[%s771_s17 + %s773_s18]]  ;;  %s124_s28 = sshll.u32 %s114_s27, 4  ;;  %s646_s28 = int_to_ptr.vmem [resolvable:$true] %s124_s28 }
  0x2d   : > { %p642_p10 = pnand %p265_p7, %p129_p8  ;;  %s111_s7 = scalar_lea.sflag [#allocation5], %s110_s14 }
  0x2e   : > { %p375_p11 = pneg %p631_p5  ;;  %s378_s18 = scalar_lea.hbm %s747_s1, 2176 }
  0x32   : > { %s264_s3 = sshll.u32 %s115_s22, 7 }
  0x33   : > { %s651_s4 = scalar_lea.hbm %s747_s1, %s264_s3 }
  0x34   : > { %s373_s11 = scalar_lea.hbm %s651_s4, 128  ;;  %p379_p1 = scmp.lt.u32.totalorder %s651_s4, %s747_s1 }
  0x35   : > { %p374_p6 = scmp.ne.s32.totalorder %s651_s4, %s373_s11  ;;  %p380_p2 = scmp.lt.u32.totalorder %s378_s18, %s373_s11 }
  0x36   : > { %p382_p7 = scmp.lt.u32.totalorder %s373_s11, %s651_s4 }
  0x37   : > { %p376_p12 = pnand %p375_p11, %p374_p6  ;;  %p381_p4 = por %p380_p2, %p379_p1 }
  0x39   : > { %p377_p0 = pneg %p376_p12  ;;  %p383_p8 = por %p382_p7, %p381_p4 }
  0x3b   : > { %p384_p3 = pnand %p383_p8, %p377_p0 }
  0x3d   : > { %387 = shalt.err (!%p384_p3)
}
  0x3e   : > { %s388_s14 = scalar_lea.vmem %s646_s28, 128  ;;  %s514_s3 = smov [#allocation4]  }
  0x3f   : > { %p389_p6 = scmp.ne.s32.totalorder %s646_s28, %s388_s14  ;;  %s393_s5 = sshll.u32 %s514_s3, 4  ;;  %s394_s5 = int_to_ptr.vmem [resolvable:$false] %s393_s5 }
  0x40   : > { %s395_s6 = scalar_lea.vmem %s394_s5, 256  ;;  %p396_p9 = scmp.lt.s32.totalorder %s646_s28, %s394_s5 }
  0x41   : > { %p391_p12 = pnand %p389_p6, %p375_p11  ;;  %p397_p1 = scmp.lt.s32.totalorder %s395_s6, %s388_s14 }
  0x43   : > { %p392_p13 = pneg %p391_p12  ;;  %p398_p2 = por %p397_p1, %p396_p9 }
  0x45   : > { %p399_p4 = pnand %p398_p2, %p392_p13 }
  0x47   : > { %402 = shalt.err (!%p399_p4)
}
  0x48   : > { %283 = dma.hbm_to_vmem [thread:$0]  (!%p631_p5), %s651_s4, 128, %s646_s28, %s111_s7  }
  0x49   : > { %133 = sbr.rel (%p642_p10) target bundleno = 107 (0x6b), region = 24  ;;  %s135_s11 = sand.u32 (!%p642_p10), 1, %s495_s23  }
  0x4a   : > { %s266_s16 = sshll.u32 (!%p642_p10), %s135_s11, 3  ;;  %s136_s17 = scalar_lea.sflag (!%p642_p10), [#allocation5], %s135_s11 }
  0x4b   : > { %s139_s18 = scalar_lea.vmem (!%p642_p10), [#allocation4], %s266_s16  ;;  %p757_p3 = scmp.ne.s32.totalorder (!%p642_p10), %s752_s8, 0 }
  0x50   : > { %470 = dma.done.wait (%p757_p3), %s136_s17, 128  }
  0x51   : > { %472 = vsyncadd (%p757_p3), %s136_s17, 4294967168  ;;  %s155_s15 = sand.u32 1, %s483_s20   ;;  %s269_s30 = sshll.u32 %s503_s0, 7  ;;  %v159_v0 = vld [vmem:[%s139_s18] sm:$0xff] }
  0x52   : > { %s267_s22 = sshll.u32 %s155_s15, 3  ;;  %s692_s14 = scalar_lea.hbm %s748_s2, %s269_s30 }
  0x53   : > { %s157_s28 = scalar_lea.vmem [#allocation7], %s267_s22  ;;  %s162_s8 = scalar_lea.sflag [#allocation6], %s155_s15 }
  0x54   : > { %s177_s4 = sshll.u32 %s157_s28, 4  ;;  %160 = vst [vmem:[%s157_s28] sm:$0xff] %v159_v0  ;;  %p758_p13 = scmp.ne.s32.totalorder %s753_s10, 0  ;;  %s687_s4 = int_to_ptr.vmem [resolvable:$true] %s177_s4 }
  0x55   : > { %s403_s3 = scalar_lea.vmem %s687_s4, 128  ;;  %s515_s5 = smov [#allocation7]  }
  0x56   : > { %p404_p9 = scmp.ne.s32.totalorder %s687_s4, %s403_s3  ;;  %s407_s0 = sshll.u32 %s515_s5, 4  ;;  %s408_s0 = int_to_ptr.vmem [resolvable:$false] %s407_s0 }
  0x57   : > { %s409_s6 = scalar_lea.vmem %s408_s0, 256  ;;  %p410_p11 = scmp.lt.s32.totalorder %s687_s4, %s408_s0 }
  0x58   : > { %p405_p5 = pnand %p404_p9, %p758_p13  ;;  %p411_p0 = scmp.lt.s32.totalorder %s409_s6, %s403_s3 }
  0x5a   : > { %p406_p10 = pneg %p405_p5  ;;  %p412_p7 = por %p411_p0, %p410_p11 }
  0x5c   : > { %p413_p8 = pnand %p412_p7, %p406_p10 }
  0x5e   : > { %416 = shalt.err (!%p413_p8)
}
  0x5f   : > { %s417_s11 = scalar_lea.hbm %s692_s14, 128  ;;  %s421_s18 = scalar_lea.hbm %s748_s2, 1152 }
  0x60   : > { %p418_p6 = scmp.ne.s32.totalorder %s692_s14, %s417_s11  ;;  %p422_p2 = scmp.lt.u32.totalorder %s692_s14, %s748_s2 }
  0x61   : > { %p423_p4 = scmp.lt.u32.totalorder %s421_s18, %s417_s11  ;;  %p425_p9 = scmp.lt.u32.totalorder %s417_s11, %s692_s14 }
  0x62   : > { %p419_p12 = pnand %p418_p6, %p758_p13 }
  0x63   : > { %p424_p3 = por %p423_p4, %p422_p2 }
  0x64   : > { %p420_p1 = pneg %p419_p12 }
  0x65   : > { %p426_p5 = por %p425_p9, %p424_p3 }
  0x67   : > { %p427_p10 = pnand %p426_p5, %p420_p1 }
  0x69   : > { %430 = shalt.err (!%p427_p10)
}
  0x6a   : > { %276 = dma.vmem_to_hbm [thread:$0]  (%p758_p13), %s687_s4, 128, %s692_s14, %s162_s8  }
  0x6b PF: > { %p289_p11 = scmp.ge.s32.totalorder %s511_s26, 2  ;;  %s189_s28 = sand.u32 1, %s479_s19  }
  0x6c   : > { %p759_p0 = scmp.ne.s32.totalorder %s754_s12, 0  ;;  %s190_s30 = scalar_lea.sflag [#allocation6], %s189_s28 }
  0x6e   : > { %p285_p7 = pnand %p289_p11, %p759_p0 }
  0x70   : > { %474 = dma.done.wait (!%p285_p7), %s190_s30, 128  }
  0x71   : > { %476 = vsyncadd (!%p285_p7), %s190_s30, 4294967168  ;;  %s22_s26 = sadd.s32 1, %s511_s26   ;;  %s760_s19 = smov %s483_s20 }
  0x72   : > { %p19_p8 = scmp.ge.s32.totalorder %s22_s26, 11   ;;  %s761_s20 = smov %s487_s21 }
  0x73   : > { %s762_s21 = smov %s612_s9  ;;  %s763_s22 = smov %s495_s23 }
  0x74   : > { %s764_s23 = smov %s499_s24  ;;  %s765_s24 = smov %s626_s13 }
  0x75   : > { %s766_s0 = smov %s507_s25  ;;  %s767_s25 = smov %s769_s29 }
  0x76   :  { %21 = sbr.rel (!%p19_p8) target bundleno = 20 (0x14), region = 69 }
  0x7d   :  { %195 = vsyncpa [#allocation5], 1 }
  0x7e   :  { %197 = vsyncpa [#allocation5 + $0x1], 1 }
  0x7f   :  { %198 = vsyncpa [#allocation6], 1 }
  0x80   :  { %200 = vsyncpa [#allocation6 + $0x1], 1 }

</bundles_post_ra>
